<compile_context>
chip_gen: v6e
topology: v6e:2x2x1
jax: 0.10.0
libtpu: 0.0.40
codegen_flags: <defaults>
</compile_context>

<pallas_src>
import functools

import jax
import jax.numpy as jnp
from jax.experimental import pallas as pl
from jax.experimental.pallas import tpu as pltpu


def _fill_halo(xpad_ref, start, c, pad, edge):
    """Fill lanes [start, start + pad*c) of xpad_ref with `pad` copies of `edge`
    ((tb, c) value) via doubling copies: ceil(log2 pad)+1 stores instead of pad."""
    xpad_ref[:, pl.ds(start, c)] = edge
    filled = 1
    while filled < pad:
        n = min(filled, pad - filled)
        xpad_ref[:, pl.ds(start + filled * c, n * c)] = xpad_ref[:, pl.ds(start, n * c)]
        filled += n


def _window_sum(xpad, kernel_size, c, l_out):
    """Stride-1 windowed sum over `kernel_size` time steps of the padded slab.

    xpad: (tb, (l_out + kernel_size - 1) * c) f32 value with time merged onto the
    lane axis.  Shift-doubling: running sums of window sizes 1, 2, 4, ... are
    built and the binary decomposition of kernel_size is combined, giving
    ~floor(log2 K) + popcount(K) - 1 shifted adds (6 for K=25) instead of K-1.
    A running sum of size m is kept valid over l_out + K - m time steps, which
    is exactly what the later combines need.
    """
    acc = None
    acc_w = 0            # time steps already accumulated into acc
    run = xpad           # running window sum of size m
    m = 1
    remaining = kernel_size
    while remaining:
        if remaining & 1:
            seg = run[:, acc_w * c:(acc_w + l_out) * c]
            acc = seg if acc is None else acc + seg
            acc_w += m
        remaining >>= 1
        if remaining:
            new_m = 2 * m
            new_len = l_out + kernel_size - new_m
            run = run[:, : new_len * c] + run[:, m * c:(m + new_len) * c]
            m = new_m
    return acc


def _moving_avg_kernel(x_ref, o_ref, xpad_ref, *, kernel_size, pad, l, c, l_out):
    """x_ref: (TB, L*C); o_ref: (TB, L_out*C); xpad_ref: (TB, (L+2*pad)*C) scratch
    in the input dtype.  Time and channels are merged on the lane axis, so a
    time shift of k is a lane shift of k*C.
    """
    x = x_ref[...]
    if pad > 0:
        # Edge-replicated, time-padded slab in VMEM (no extra HBM traffic).
        xpad_ref[:, pl.ds(pad * c, l * c)] = x
        _fill_halo(xpad_ref, 0, c, pad, x[:, :c])                       # front halo
        _fill_halo(xpad_ref, (pad + l) * c, c, pad, x[:, (l - 1) * c:])  # back halo
        xpad = xpad_ref[...].astype(jnp.float32)
    else:
        xpad = x.astype(jnp.float32)

    acc = _window_sum(xpad, kernel_size, c, l_out)
    o_ref[...] = (acc * (1.0 / kernel_size)).astype(o_ref.dtype)


def _pick_batch_tile(b, row_bytes, itemsize,
                     target_bytes=4 * 1024 * 1024, min_bytes=512 * 1024):
    """Batch rows per grid step.

    * dtype-aware sublane multiple (8 for 4-byte, 16 for 2-byte, 32 for 1-byte)
      or the whole batch,
    * ~target_bytes per input block,
    * >=2 grid steps when the batch allows (both v7x TensorCores under
      dimension_semantics=("parallel",)),
    * >=4 steps when blocks stay >= min_bytes (hides pipeline prologue/epilogue).
    """
    mult = {4: 8, 2: 16, 1: 32}.get(itemsize, 8)
    if b <= mult:
        return int(b)
    cap = (target_bytes // max(1, row_bytes)) // mult * mult
    tb = max(mult, min(b, cap))
    half = (b // 2) // mult * mult
    if half >= mult:
        tb = min(tb, half)
    quarter = (b // 4) // mult * mult
    if quarter >= mult and quarter * row_bytes >= min_bytes:
        tb = min(tb, quarter)
    return int(max(mult, min(tb, b)))


def _moving_avg_stride1(x, kernel_size):
    """Dense (stride=1) moving average: (B, L, C) -> (B, L + 2*pad - K + 1, C)."""
    b, l, c = x.shape
    pad = (kernel_size - 1) // 2
    l_pad = l + 2 * pad
    l_out = l_pad - kernel_size + 1
    assert l_out >= 1, "kernel_size too large for this sequence length"

    # Merge (L, C) -> L*C so time sits on the lane axis (free row-major reshape).
    xr = x.reshape(b, l * c)
    itemsize = x.dtype.itemsize
    tb = _pick_batch_tile(b, l * c * itemsize, itemsize)
    grid = (pl.cdiv(b, tb),)

    kernel = functools.partial(
        _moving_avg_kernel, kernel_size=kernel_size, pad=pad, l=l, c=c, l_out=l_out
    )

    out = pl.pallas_call(
        kernel,
        out_shape=jax.ShapeDtypeStruct((b, l_out * c), x.dtype),
        grid_spec=pltpu.PrefetchScalarGridSpec(
            num_scalar_prefetch=0,
            grid=grid,
            in_specs=[pl.BlockSpec((tb, l * c), lambda i: (i, 0))],
            out_specs=pl.BlockSpec((tb, l_out * c), lambda i: (i, 0)),
            # Padded slab kept in the input dtype (halves scratch for bf16).
            scratch_shapes=[pltpu.VMEM((tb, l_pad * c), x.dtype)],
        ),
        compiler_params=pltpu.CompilerParams(
            dimension_semantics=("parallel",),
            vmem_limit_bytes=48 * 1024 * 1024,  # headroom on v7x's 64 MiB VMEM
        ),
    )(xr)
    return out.reshape(b, l_out, c)


def moving_avg(x, kernel_size, stride=1):
    """Equivalent of PatchTST moving_avg.forward: (B, L, C) -> (B, L_out, C)."""
    b, l, c = x.shape
    pad = (kernel_size - 1) // 2
    l_pad = l + 2 * pad
    l_out = (l_pad - kernel_size) // stride + 1

    dense = _moving_avg_stride1(x, kernel_size)  # stride-1 window averages
    if stride == 1:
        return dense
    # stride > 1 fallback (unused by PatchTST): subsample the dense averages.
    return dense[:, ::stride, :][:, :l_out, :]


def _reference_moving_avg(x, kernel_size, stride):
    # Pure-JAX reference mirroring the PyTorch module.
    pad = (kernel_size - 1) // 2
    front = jnp.repeat(x[:, 0:1, :], pad, axis=1)
    end = jnp.repeat(x[:, -1:, :], pad, axis=1)
    xp = jnp.concatenate([front, x, end], axis=1)
    l_pad = xp.shape[1]
    l_out = (l_pad - kernel_size) // stride + 1
    outs = [
        jnp.mean(xp[:, t * stride: t * stride + kernel_size, :], axis=1)
        for t in range(l_out)
    ]
    return jnp.stack(outs, axis=1)


if __name__ == "__main__":
    key = jax.random.PRNGKey(0)

    configs = [
        # (batch, seq_len, channels, kernel_size, stride)
        (2, 16, 8, 5, 1),     # small demo shape
        (2, 64, 7, 25, 1),    # PatchTST default kernel_size=25, odd channel count
        (32, 24, 7, 4, 1),    # even kernel_size, multi-step batch grid
        (3, 32, 7, 7, 2),     # stride > 1 fallback path
    ]

    for idx, (b, l, c, ks, st) in enumerate(configs):
        x = jax.random.normal(jax.random.fold_in(key, idx), (b, l, c), dtype=jnp.float32)
        fn = jax.jit(functools.partial(moving_avg, kernel_size=ks, stride=st))
        out = jax.block_until_ready(fn(x))
        ref = _reference_moving_avg(x, ks, st)
        assert out.shape == ref.shape, (idx, out.shape, ref.shape)
        assert jnp.allclose(out, ref, atol=1e-5, rtol=1e-5), f"mismatch vs reference (cfg{idx})"

    print("KERNEL_OK")
</pallas_src>

<mosaic_0001>
module attributes {stable_mosaic.version = 11 : i64} {
  func.func @_moving_avg_kernel(%arg0: i32, %arg1: memref<2x128xf32, #tpu.memory_space<vmem>>, %arg2: memref<2x128xf32, #tpu.memory_space<vmem>>, %arg3: memref<2x160xf32, #tpu.memory_space<vmem>>) attributes {dimension_semantics = [#tpu.dimension_semantics<parallel>], iteration_bounds = array<i64: 1>, scalar_prefetch = 0 : i64, scratch_operands = 1 : i64, tpu.core_type = #tpu.core_type<tc>, window_params = [{transform_indices = @transform_0, window_bounds = array<i64: 2, 128>}, {transform_indices = @transform_1, window_bounds = array<i64: 2, 128>}]} {
    %c0 = arith.constant 0 : index
    %c0_0 = arith.constant 0 : index
    %0 = vector.load %arg1[%c0, %c0_0] : memref<2x128xf32, #tpu.memory_space<vmem>>, vector<2x128xf32>
    %c0_1 = arith.constant 0 : index
    %c16 = arith.constant 16 : index
    %1 = vector.load %arg3[%c0_1, %c16] : memref<2x160xf32, #tpu.memory_space<vmem>>, vector<2x128xf32>
    tpu.vector_store %arg3[%c0_1, %c16], %0 {strides = array<i32>} : memref<2x160xf32, #tpu.memory_space<vmem>>, vector<2x128xf32>,
    %2 = vector.extract_strided_slice %0 {offsets = [0, 0], sizes = [2, 8], strides = [1, 1]} : vector<2x128xf32> to vector<2x8xf32>
    %c0_2 = arith.constant 0 : index
    %c0_3 = arith.constant 0 : index
    %3 = vector.load %arg3[%c0_2, %c0_3] : memref<2x160xf32, #tpu.memory_space<vmem>>, vector<2x8xf32>
    tpu.vector_store %arg3[%c0_2, %c0_3], %2 {strides = array<i32>} : memref<2x160xf32, #tpu.memory_space<vmem>>, vector<2x8xf32>,
    %c0_4 = arith.constant 0 : index
    %c0_5 = arith.constant 0 : index
    %4 = vector.load %arg3[%c0_4, %c0_5] : memref<2x160xf32, #tpu.memory_space<vmem>>, vector<2x8xf32>
    %c0_6 = arith.constant 0 : index
    %c8 = arith.constant 8 : index
    %5 = vector.load %arg3[%c0_6, %c8] : memref<2x160xf32, #tpu.memory_space<vmem>>, vector<2x8xf32>
    tpu.vector_store %arg3[%c0_6, %c8], %4 {strides = array<i32>} : memref<2x160xf32, #tpu.memory_space<vmem>>, vector<2x8xf32>,
    %6 = vector.extract_strided_slice %0 {offsets = [0, 120], sizes = [2, 8], strides = [1, 1]} : vector<2x128xf32> to vector<2x8xf32>
    %c0_7 = arith.constant 0 : index
    %c144 = arith.constant 144 : index
    %7 = vector.load %arg3[%c0_7, %c144] : memref<2x160xf32, #tpu.memory_space<vmem>>, vector<2x8xf32>
    tpu.vector_store %arg3[%c0_7, %c144], %6 {strides = array<i32>} : memref<2x160xf32, #tpu.memory_space<vmem>>, vector<2x8xf32>,
    %c0_8 = arith.constant 0 : index
    %c144_9 = arith.constant 144 : index
    %8 = vector.load %arg3[%c0_8, %c144_9] : memref<2x160xf32, #tpu.memory_space<vmem>>, vector<2x8xf32>
    %c0_10 = arith.constant 0 : index
    %c152 = arith.constant 152 : index
    %9 = vector.load %arg3[%c0_10, %c152] : memref<2x160xf32, #tpu.memory_space<vmem>>, vector<2x8xf32>
    tpu.vector_store %arg3[%c0_10, %c152], %8 {strides = array<i32>} : memref<2x160xf32, #tpu.memory_space<vmem>>, vector<2x8xf32>,
    %c0_11 = arith.constant 0 : index
    %c0_12 = arith.constant 0 : index
    %10 = vector.load %arg3[%c0_11, %c0_12] : memref<2x160xf32, #tpu.memory_space<vmem>>, vector<2x160xf32>
    %11 = vector.extract_strided_slice %10 {offsets = [0, 0], sizes = [2, 128], strides = [1, 1]} : vector<2x160xf32> to vector<2x128xf32>
    %12 = vector.extract_strided_slice %10 {offsets = [0, 0], sizes = [2, 152], strides = [1, 1]} : vector<2x160xf32> to vector<2x152xf32>
    %13 = vector.extract_strided_slice %10 {offsets = [0, 8], sizes = [2, 152], strides = [1, 1]} : vector<2x160xf32> to vector<2x152xf32>
    %14 = arith.addf %12, %13 : vector<2x152xf32>
    %15 = vector.extract_strided_slice %14 {offsets = [0, 0], sizes = [2, 136], strides = [1, 1]} : vector<2x152xf32> to vector<2x136xf32>
    %16 = vector.extract_strided_slice %14 {offsets = [0, 16], sizes = [2, 136], strides = [1, 1]} : vector<2x152xf32> to vector<2x136xf32>
    %17 = arith.addf %15, %16 : vector<2x136xf32>
    %18 = vector.extract_strided_slice %17 {offsets = [0, 8], sizes = [2, 128], strides = [1, 1]} : vector<2x136xf32> to vector<2x128xf32>
    %19 = arith.addf %11, %18 : vector<2x128xf32>
    %cst = arith.constant 2.000000e-01 : f32
    %20 = vector.broadcast %cst : f32 to vector<2x128xf32>
    %21 = arith.mulf %19, %20 : vector<2x128xf32>
    %c0_13 = arith.constant 0 : index
    %c0_14 = arith.constant 0 : index
    %22 = vector.load %arg2[%c0_13, %c0_14] : memref<2x128xf32, #tpu.memory_space<vmem>>, vector<2x128xf32>
    tpu.vector_store %arg2[%c0_13, %c0_14], %21 {strides = array<i32>} : memref<2x128xf32, #tpu.memory_space<vmem>>, vector<2x128xf32>,
    return
  }
  func.func @transform_0(%arg0: i32) -> (i32, i32) {
    %c0_i32 = arith.constant 0 : i32
    %c0_i32_0 = arith.constant 0 : i32
    return %arg0, %c0_i32 : i32, i32
  }
  func.func @transform_1(%arg0: i32) -> (i32, i32) {
    %c0_i32 = arith.constant 0 : i32
    %c0_i32_0 = arith.constant 0 : i32
    return %arg0, %c0_i32 : i32, i32
  }
}

</mosaic_0001>

<bundles_post_ra>
// kernel: moving_avg.1
= control target key start
LH: loop header
LB: loop body
LE: loop exit
PB: predicated region body
PF: predicated region fallthrough
CT: control target
= control target key end

     0   :  { %v13_v0 = vlaneseq  ;;  %v84_v1 = vmov 1983009808   ;;  %s85_s8 = smov 16   ;;  %s86_s9 = smov 24   ;;  %vm23_vm0 = vcmask 1041536   ;;  %vm24_vm1 = vcmask 125954   ;;  %s106_s0 = inlined_call_operand.vmem [shape: f32[2,128], index: 0, kind: input, shape index: {}]   ;;  %s107_s1 = inlined_call_operand.vmem [shape: f32[2,128], index: 1, kind: output, shape index: {}]  }
   0x1   :  { %v11_v2 = vunpack.c.l.s4 %v84_v1  ;;  %v8_v5 = vld [vmem:[%s106_s0] sm:$0x3]  ;;  %vm20_vm2 = vcmask 130048   ;;  %vm25_vm3 = vmor %vm24_vm1, %vm23_vm0  ;;  %vm27_vm4 = vcmask 58368   ;;  %vm39_vm5 = vcmask 189568   ;;  %s87_s0 = smov 8  }
   0x2   :  { %v14_v3 = vshrl.u32 %v13_v0, 7  ;;  %vm34_vm6 = vcmask 123968   ;;  %vm46_vm7 = vcmask 255168   ;;  %s88_s10 = smov 120   ;;  %vm53_vm8 = vcmask 982016   ;;  %s89_s11 = smov 112  }
   0x3   :  { %v12_v4 = vunpack.c.0.s8 %v11_v2  ;;  %vm61_vm9 = vcmask 916480  }
   0x5   :  { %v15_v6 = vsub.s32 %v12_v4, %v14_v3 }
   0x7   :  { %v16_v7 = vrot.slane %v8_v5, %v15_v6 }
   0x9   :  { %17 = vrot.lane.b32.xlu0 %v16_v7, %s85_s8 }
   0xd   :  { %36 = vrot.lane.b32.xlu0 %v16_v7, %s86_s9 }
  0x7b   :  { %v18_v8 = vpop.permute.xlu0 %17 }
  0x7c   :  { %v19_v9 = vrot.slane %v18_v8, 6 }
  0x7e   :  { %v21_v10 = vsel %vm20_vm2, %v19_v9, %v18_v8 }
  0x7f   :  { %26 = vst.msk [vmem:[#allocation2] sm:$0xf] %vm25_vm3, %v21_v10  ;;  %v37_v11 = vpop.permute.xlu0 %36 }
  0x80   :  { %28 = vst.msk [vmem:[#allocation2] sm:$0x3] %vm27_vm4, %v8_v5 }
  0x81   :  { %40 = vst.msk [vmem:[#allocation2 + $0x2] sm:$0x3] %vm39_vm5, %v37_v11 }
  0x87   :  { %v29_v12 = vld [vmem:[#allocation2] sm:$0x3] }
  0x88   :  { %31 = vrot.lane.b32.xlu1 %v29_v12, %s87_s0  ;;  %v41_v13 = vld [vmem:[#allocation2 + $0x2] sm:$0x3] }
  0x8c   :  { %43 = vrot.lane.b32.xlu1 %v41_v13, %s87_s0 }
  0xfa   :  { %v32_v14 = vpop.permute.xlu1 %31 }
  0xfb   :  { %35 = vst.msk [vmem:[#allocation2] sm:$0x3] %vm34_vm6, %v32_v14 }
  0xfe   :  { %v44_v15 = vpop.permute.xlu1 %43 }
  0xff   :  { %47 = vst.msk [vmem:[#allocation2 + $0x2] sm:$0x3] %vm46_vm7, %v44_v15 }
 0x106   :  { %v48_v16 = vld [vmem:[#allocation2] sm:$0xf] }
 0x107   :  { %50 = vrot.lane.b32.xlu0 %v48_v16, %s88_s10 }
 0x179   :  { %v51_v17 = vpop.permute.xlu0 %50 }
 0x17a   :  { %v52_v18 = vrot.slane %v51_v17, 2 }
 0x17c   :  { %v54_v19 = vsel %vm53_vm8, %v51_v17, %v52_v18 }
 0x17d   :  { %v56_v20 = vadd.f32 %v54_v19, %v48_v16 }
 0x17f   :  { %58 = vrot.lane.b32.xlu1 %v56_v20, %s89_s11 }
 0x1f1   :  { %v59_v21 = vpop.permute.xlu1 %58 }
 0x1f2   :  { %v60_v22 = vrot.slane %v59_v21, 2 }
 0x1f4   :  { %v62_v23 = vsel %vm61_vm9, %v59_v21, %v60_v22 }
 0x1f5   :  { %v64_v24 = vadd.f32 %v62_v23, %v56_v20 }
 0x1f7   :  { %66 = vrot.lane.b32.xlu0 %v64_v24, %s88_s10 }
 0x269   :  { %v67_v25 = vpop.permute.xlu0 %66 }
 0x26a   :  { %v68_v26 = vrot.slane %v67_v25, 2 }
 0x26c   :  { %v69_v27 = vsel %vm53_vm8, %v67_v25, %v68_v26 }
 0x26d   :  { %v71_v28 = vadd.f32 %v69_v27, %v48_v16 }
 0x26f   :  { %v72_v29 = vmul.f32 0.2, %v71_v28 }
 0x271   :  { %73 = vst [vmem:[%s107_s1] sm:$0x3] %v72_v29 }

</bundles_post_ra>
